<compile_context>
chip_gen: v7x
topology: tpu7x:2x2x1
jax: 0.10.0
libtpu: 0.0.40
codegen_flags: <defaults>
</compile_context>

<pallas_src>
import math

import jax
import jax.numpy as jnp
from jax.experimental import pallas as pl
from jax.experimental.pallas import tpu as pltpu

D_MODEL = 32
D_K = 32
D_V = 32
N_HEAD = 4
D_FF = 128
LN_EPS = 1e-5
_NEG_INF = -1e9


def _make_kernel(b_tile, seq_len, compute_dtype, return_attention):
    cd = compute_dtype
    approx = jnp.dtype(cd) != jnp.dtype(jnp.float32)
    NHK = N_HEAD * D_K          # 128

    def kernel(x_ref, bias_ref,
               wqkv_ref, bqkv_ref, wo_ref, bo_ref, g_ref, beta_ref,
               w1_ref, b1_ref, w2_ref, b2_ref,
               out_ref, *maybe_attn):
        bt, S = b_tile, seq_len
        rows = bt * S

        x = x_ref[...]                                        # (rows, 32) f32
        xc = x.astype(cd)

        # Fused Q|K|V projection: one (rows,32)@(32,384) matmul with f32 acc.
        # The 1/sqrt(d_k) score scale is already folded into the Q columns.
        qkv = jnp.dot(xc, wqkv_ref[...],
                      preferred_element_type=jnp.float32) + bqkv_ref[...]
        qkv3 = qkv.reshape(bt, S, 3 * NHK).astype(cd)         # (bt, S, 384)

        # (bt, 1, S) additive key-padding bias; broadcast over the query dim.
        bias = bias_ref[...].astype(jnp.float32)

        ctx_heads = []
        for h in range(N_HEAD):                               # static unroll (4 heads)
            qh = qkv3[:, :, h * D_K:(h + 1) * D_K]
            kh = qkv3[:, :, NHK + h * D_K:NHK + (h + 1) * D_K]
            vh = qkv3[:, :, 2 * NHK + h * D_V:2 * NHK + (h + 1) * D_V]

            # Contract on the shared last dim — no explicit transpose.
            scores = jnp.einsum("bqd,bkd->bqk", qh, kh,
                                preferred_element_type=jnp.float32) + bias
            m = jnp.max(scores, axis=-1, keepdims=True)
            e = jnp.exp(scores - m)
            denom = jnp.sum(e, axis=-1, keepdims=True)
            attn = e * pl.reciprocal(denom, approx=approx)     # (bt, S, S) f32
            if return_attention:
                # Per-head lane-dense store; avoids keeping 4 S^2 maps + a
                # concatenated copy live in VMEM on the debug path.
                maybe_attn[0][:, h:h + 1, :, :] = attn.reshape(bt, 1, S, S)

            ctx_heads.append(
                jnp.einsum("bqk,bkd->bqd", attn.astype(cd), vh,
                           preferred_element_type=jnp.float32))

        # Single K=128 output projection (== concat(ctx) @ Wo), then residual
        # + output-projection bias. No acc-carried serialization across heads.
        ctx_all = jnp.concatenate(ctx_heads, axis=-1).reshape(rows, N_HEAD * D_V)
        acc = x + bo_ref[...] + jnp.dot(ctx_all.astype(cd), wo_ref[...],
                                        preferred_element_type=jnp.float32)

        # LayerNorm (two-pass, f32, eps=1e-5).
        mu = jnp.mean(acc, axis=-1, keepdims=True)
        dev = acc - mu
        var = jnp.mean(dev * dev, axis=-1, keepdims=True)
        ln = dev * jax.lax.rsqrt(var + LN_EPS) * g_ref[...] + beta_ref[...]

        # Position-wise FFN: fc2(relu(fc1(ln)))  (no residual / norm, as in PyTorch).
        h1 = jnp.dot(ln.astype(cd), w1_ref[...],
                     preferred_element_type=jnp.float32) + b1_ref[...]
        h1 = jnp.maximum(h1, 0.0)
        y = jnp.dot(h1.astype(cd), w2_ref[...],
                    preferred_element_type=jnp.float32) + b2_ref[...]
        out_ref[...] = y.astype(out_ref.dtype)

    return kernel


def _pick_b_tile(batch, seq_len, target_rows=2048):
    """Batch tile: big MXU M-dim, sublane-aligned, >=2 grid steps, no pad blowup."""
    # b_tile must be a multiple of `step` so (b_tile * S) % 8 == 0 (sublane tiling)
    # whenever there is more than one grid step.
    step = 8 // math.gcd(seq_len, 8)
    bt = -(-max(1, target_rows // seq_len) // step) * step
    # Keep at least 2 grid steps when the batch allows (v7x: 2 TensorCores share
    # the single "parallel" grid axis; also enables DMA pipelining elsewhere).
    if batch >= 2 * step:
        cap = max(step, ((batch // 2) // step) * step)
        bt = min(bt, cap)
    # Tiny batch: one full-array block (no alignment constraint, no padding).
    if bt >= batch:
        return batch
    # Avoid ballooning the padded batch (>25% wasted rows) for awkward (B, S).
    while bt > step and ((-batch) % bt) * 4 > batch:
        bt -= step
    return bt


def encoder_layer(x, key_pad_mask, params, *,
                  compute_dtype=jnp.bfloat16, return_attention=False,
                  b_tile=None, target_rows=2048):
    """x: (B, S, d_model) f32; key_pad_mask: (B, S) bool (True == padded key).

    Matches PyTorch EncoderLayer with enc_self_attn_mask = get_attn_pad_mask(ids),
    i.e. a key-padding mask broadcast across the query dimension.
    """
    B, S, D = x.shape
    assert D == D_MODEL
    assert key_pad_mask.shape == (B, S)

    if b_tile is None:
        b_tile = _pick_b_tile(B, S, target_rows)
    n_blocks = -(-B // b_tile)
    if n_blocks > 1 and (b_tile * S) % 8 != 0:
        raise ValueError("b_tile * seq_len must be a multiple of 8 when grid > 1 step")
    B_pad = n_blocks * b_tile
    if B_pad != B:
        pad = B_pad - B
        x = jnp.pad(x, ((0, pad), (0, 0), (0, 0)))
        key_pad_mask = jnp.pad(key_pad_mask, ((0, pad), (0, 0)))

    # Key-padding mask as a (B, 1, S) bf16 additive bias (S× less HBM traffic
    # than a full (B, S, S) bias); broadcast over the query dim in-kernel.
    bias = jnp.where(key_pad_mask, _NEG_INF, 0.0).astype(jnp.bfloat16)[:, None, :]
    x_flat = x.astype(jnp.float32).reshape(B_pad * S, D_MODEL)

    cd = compute_dtype
    scale = 1.0 / math.sqrt(D_K)
    # Fused Q|K|V weight/bias; 1/sqrt(d_k) folded into the Q columns.
    wqkv = jnp.concatenate([params["wq"] * scale, params["wk"], params["wv"]],
                           axis=1).astype(cd)                       # (32, 384)
    bqkv = jnp.concatenate([params["bq"] * scale, params["bk"], params["bv"]],
                           axis=1).astype(jnp.float32)              # (1, 384)
    param_list = [
        wqkv, bqkv,
        params["wo"].astype(cd), params["bo"],
        params["ln_g"], params["ln_b"],
        params["w1"].astype(cd), params["b1"],
        params["w2"].astype(cd), params["b2"],
    ]

    def full_spec(shape):
        nd = len(shape)
        return pl.BlockSpec(shape, lambda b, _nd=nd: (0,) * _nd)

    in_specs = (
        [pl.BlockSpec((b_tile * S, D_MODEL), lambda b: (b, 0)),     # x (flattened rows)
         pl.BlockSpec((b_tile, 1, S), lambda b: (b, 0, 0))]         # key-pad bias
        + [full_spec(p.shape) for p in param_list]
    )

    out_specs = [pl.BlockSpec((b_tile * S, D_MODEL), lambda b: (b, 0))]
    out_shape = [jax.ShapeDtypeStruct((B_pad * S, D_MODEL), jnp.float32)]
    if return_attention:
        out_specs.append(pl.BlockSpec((b_tile, N_HEAD, S, S), lambda b: (b, 0, 0, 0)))
        out_shape.append(jax.ShapeDtypeStruct((B_pad, N_HEAD, S, S), jnp.float32))

    kernel = _make_kernel(b_tile, S, cd, return_attention)

    # VMEM budget: double-buffered I/O + in-kernel temporaries, 1.5x headroom,
    # clamped to stay under the v7x physical ceiling (64 MiB).
    cd_b = jnp.dtype(cd).itemsize
    rows = b_tile * S
    param_bytes = sum(int(p.size) * p.dtype.itemsize for p in param_list)
    io_bytes = 2 * (rows * D_MODEL * 4 * 2 + b_tile * S * 2 + param_bytes)
    if return_attention:
        io_bytes += 2 * b_tile * N_HEAD * S * S * 4
    tmp_bytes = (rows * 3 * N_HEAD * D_K * (4 + cd_b)      # fused qkv (f32 + cd view)
                 + 3 * b_tile * S * S * 4                   # scores / exp / attn live
                 + rows * N_HEAD * D_V * (4 + cd_b)         # per-head ctx + concat
                 + rows * D_FF * (4 + cd_b)                 # FFN hidden
                 + rows * D_MODEL * 4 * 3)                  # x / acc / ln
    vmem_limit = int(min(60 * 2 ** 20, max(32 * 2 ** 20, 1.5 * (io_bytes + tmp_bytes))))

    flops = n_blocks * (
        2 * rows * D_MODEL * 3 * N_HEAD * D_K               # fused QKV projection
        + 2 * N_HEAD * b_tile * S * S * (D_K + D_V)         # scores + ctx
        + 2 * rows * N_HEAD * D_V * D_MODEL                 # output projection
        + 2 * rows * D_MODEL * D_FF * 2)                    # FFN
    cost = pl.CostEstimate(
        flops=int(flops),
        transcendentals=int(n_blocks * N_HEAD * b_tile * S * S),
        bytes_accessed=int(x_flat.size * 4 * 2 + int(bias.size) * 2 + param_bytes
                           + (B_pad * N_HEAD * S * S * 4 if return_attention else 0)))

    result = pl.pallas_call(
        kernel,
        grid=(n_blocks,),
        in_specs=in_specs,
        out_specs=tuple(out_specs),
        out_shape=tuple(out_shape),
        compiler_params=pltpu.CompilerParams(
            dimension_semantics=("parallel",),
            vmem_limit_bytes=vmem_limit),
        cost_estimate=cost,
    )(x_flat, bias, *param_list)

    out = result[0].reshape(B_pad, S, D_MODEL)[:B]
    if return_attention:
        return out, result[1][:B]
    return out


def init_params(key):
    ks = jax.random.split(key, 8)
    std = 0.02
    return {
        "wq": jax.random.normal(ks[0], (D_MODEL, N_HEAD * D_K), jnp.float32) * std,
        "bq": jnp.zeros((1, N_HEAD * D_K), jnp.float32),
        "wk": jax.random.normal(ks[1], (D_MODEL, N_HEAD * D_K), jnp.float32) * std,
        "bk": jnp.zeros((1, N_HEAD * D_K), jnp.float32),
        "wv": jax.random.normal(ks[2], (D_MODEL, N_HEAD * D_V), jnp.float32) * std,
        "bv": jnp.zeros((1, N_HEAD * D_V), jnp.float32),
        "wo": jax.random.normal(ks[3], (N_HEAD * D_V, D_MODEL), jnp.float32) * std,
        "bo": jnp.zeros((1, D_MODEL), jnp.float32),
        "ln_g": jnp.ones((1, D_MODEL), jnp.float32),
        "ln_b": jnp.zeros((1, D_MODEL), jnp.float32),
        "w1": jax.random.normal(ks[4], (D_MODEL, D_FF), jnp.float32) * std,
        "b1": jnp.zeros((1, D_FF), jnp.float32),
        "w2": jax.random.normal(ks[5], (D_FF, D_MODEL), jnp.float32) * std,
        "b2": jnp.zeros((1, D_MODEL), jnp.float32),
    }


def reference_encoder_layer(x, key_pad_mask, p):
    """Pure-JAX (f32) reference mirroring the PyTorch forward exactly."""
    B, S, _ = x.shape
    q = (x @ p["wq"] + p["bq"]).reshape(B, S, N_HEAD, D_K).transpose(0, 2, 1, 3)
    k = (x @ p["wk"] + p["bk"]).reshape(B, S, N_HEAD, D_K).transpose(0, 2, 1, 3)
    v = (x @ p["wv"] + p["bv"]).reshape(B, S, N_HEAD, D_V).transpose(0, 2, 1, 3)
    mask = key_pad_mask[:, None, None, :]   # == get_attn_pad_mask broadcast
    scores = jnp.einsum("bhqd,bhkd->bhqk", q, k) / jnp.sqrt(jnp.float32(D_K))
    scores = jnp.where(mask, -1e9, scores)
    attn = jax.nn.softmax(scores, axis=-1)
    ctx = jnp.einsum("bhqk,bhkd->bhqd", attn, v)
    ctx = ctx.transpose(0, 2, 1, 3).reshape(B, S, N_HEAD * D_V)
    out = ctx @ p["wo"] + p["bo"]
    out = out + x
    mu = jnp.mean(out, axis=-1, keepdims=True)
    var = jnp.mean((out - mu) ** 2, axis=-1, keepdims=True)
    ln = (out - mu) / jnp.sqrt(var + LN_EPS) * p["ln_g"] + p["ln_b"]
    h1 = jnp.maximum(ln @ p["w1"] + p["b1"], 0.0)
    return h1 @ p["w2"] + p["b2"], attn


if __name__ == "__main__":
    key = jax.random.PRNGKey(0)
    kx, kp, kx2 = jax.random.split(key, 3)
    params = init_params(kp)

    # --- strict validation: f32 compute path, attention map returned ---
    B, S = 2, 8
    x = jax.random.normal(kx, (B, S, D_MODEL), jnp.float32)
    # Key-padding mask (True == padded key), as produced by get_attn_pad_mask.
    key_pad = jnp.zeros((B, S), jnp.bool_).at[:, -2:].set(True)

    enc_out, attn_map = encoder_layer(x, key_pad, params,
                                      compute_dtype=jnp.float32,
                                      return_attention=True)
    enc_out = jax.block_until_ready(enc_out)
    attn_map = jax.block_until_ready(attn_map)
    ref_out, ref_attn = reference_encoder_layer(x, key_pad, params)
    assert jnp.allclose(enc_out, ref_out, atol=1e-4, rtol=1e-4), "enc_outputs mismatch (f32)"
    assert jnp.allclose(attn_map, ref_attn, atol=1e-5, rtol=1e-5), "attention map mismatch (f32)"

    # --- fast path: bf16 MXU operands, 2-step batch-blocked grid, no attn map ---
    B2, S2 = 4, 8
    x2 = jax.random.normal(kx2, (B2, S2, D_MODEL), jnp.float32)
    key_pad2 = jnp.zeros((B2, S2), jnp.bool_).at[:, -3:].set(True)

    enc_out2 = encoder_layer(x2, key_pad2, params,
                             compute_dtype=jnp.bfloat16,
                             return_attention=False)
    enc_out2 = jax.block_until_ready(enc_out2)
    ref_out2, _ = reference_encoder_layer(x2, key_pad2, params)
    assert jnp.allclose(enc_out2, ref_out2, atol=5e-3, rtol=5e-2), "enc_outputs mismatch (bf16)"

    print("KERNEL_OK")
</pallas_src>

<mosaic_0001>
module attributes {stable_mosaic.version = 11 : i64} {
  func.func @kernel(%arg0: i32, %arg1: memref<8x32xf32, #tpu.memory_space<vmem>>, %arg2: memref<1x1x8xbf16, #tpu.memory_space<vmem>>, %arg3: memref<32x384xf32, #tpu.memory_space<vmem>>, %arg4: memref<1x384xf32, #tpu.memory_space<vmem>>, %arg5: memref<128x32xf32, #tpu.memory_space<vmem>>, %arg6: memref<1x32xf32, #tpu.memory_space<vmem>>, %arg7: memref<1x32xf32, #tpu.memory_space<vmem>>, %arg8: memref<1x32xf32, #tpu.memory_space<vmem>>, %arg9: memref<32x128xf32, #tpu.memory_space<vmem>>, %arg10: memref<1x128xf32, #tpu.memory_space<vmem>>, %arg11: memref<128x32xf32, #tpu.memory_space<vmem>>, %arg12: memref<1x32xf32, #tpu.memory_space<vmem>>, %arg13: memref<8x32xf32, #tpu.memory_space<vmem>>, %arg14: memref<1x4x8x8xf32, #tpu.memory_space<vmem>>) attributes {dimension_semantics = [#tpu.dimension_semantics<parallel>], iteration_bounds = array<i64: 2>, scalar_prefetch = 0 : i64, scratch_operands = 0 : i64, tpu.core_type = #tpu.core_type<tc>, window_params = [{transform_indices = @transform_0, window_bounds = array<i64: 8, 32>}, {transform_indices = @transform_1, window_bounds = array<i64: 1, 1, 8>}, {pipeline_mode = #tpu.pipeline_mode<synchronous>, transform_indices = @transform_2, window_bounds = array<i64: 32, 384>}, {pipeline_mode = #tpu.pipeline_mode<synchronous>, transform_indices = @transform_3, window_bounds = array<i64: 1, 384>}, {pipeline_mode = #tpu.pipeline_mode<synchronous>, transform_indices = @transform_4, window_bounds = array<i64: 128, 32>}, {pipeline_mode = #tpu.pipeline_mode<synchronous>, transform_indices = @transform_5, window_bounds = array<i64: 1, 32>}, {pipeline_mode = #tpu.pipeline_mode<synchronous>, transform_indices = @transform_6, window_bounds = array<i64: 1, 32>}, {pipeline_mode = #tpu.pipeline_mode<synchronous>, transform_indices = @transform_7, window_bounds = array<i64: 1, 32>}, {pipeline_mode = #tpu.pipeline_mode<synchronous>, transform_indices = @transform_8, window_bounds = array<i64: 32, 128>}, {pipeline_mode = #tpu.pipeline_mode<synchronous>, transform_indices = @transform_9, window_bounds = array<i64: 1, 128>}, {pipeline_mode = #tpu.pipeline_mode<synchronous>, transform_indices = @transform_10, window_bounds = array<i64: 128, 32>}, {pipeline_mode = #tpu.pipeline_mode<synchronous>, transform_indices = @transform_11, window_bounds = array<i64: 1, 32>}, {transform_indices = @transform_12, window_bounds = array<i64: 8, 32>}, {transform_indices = @transform_13, window_bounds = array<i64: 1, 4, 8, 8>}]} {
    %c0 = arith.constant 0 : index
    %c0_0 = arith.constant 0 : index
    %0 = vector.load %arg1[%c0, %c0_0] : memref<8x32xf32, #tpu.memory_space<vmem>>, vector<8x32xf32>
    %c0_1 = arith.constant 0 : index
    %c0_2 = arith.constant 0 : index
    %1 = vector.load %arg3[%c0_1, %c0_2] : memref<32x384xf32, #tpu.memory_space<vmem>>, vector<32x384xf32>
    %cst = arith.constant dense<0.000000e+00> : vector<8x384xf32>
    %2 = tpu.matmul %0, %1, %cst {dimension_numbers = #tpu.dot_dimension_numbers<[1], [0], [0], [1], [0, 0, 1, 1], [], []>} : vector<8x32xf32>, vector<32x384xf32>, vector<8x384xf32> -> vector<8x384xf32>
    %c0_3 = arith.constant 0 : index
    %c0_4 = arith.constant 0 : index
    %3 = vector.load %arg4[%c0_3, %c0_4] : memref<1x384xf32, #tpu.memory_space<vmem>>, vector<1x384xf32>
    %4 = vector.broadcast %3 : vector<1x384xf32> to vector<8x384xf32>
    %5 = arith.addf %2, %4 : vector<8x384xf32>
    %6 = vector.shape_cast %5 : vector<8x384xf32> to vector<1x8x384xf32>
    %c0_5 = arith.constant 0 : index
    %c0_6 = arith.constant 0 : index
    %c0_7 = arith.constant 0 : index
    %7 = vector.load %arg2[%c0_5, %c0_6, %c0_7] : memref<1x1x8xbf16, #tpu.memory_space<vmem>>, vector<1x1x8xbf16>
    %8 = arith.extf %7 : vector<1x1x8xbf16> to vector<1x1x8xf32>
    %9 = vector.extract_strided_slice %6 {offsets = [0, 0, 0], sizes = [1, 8, 32], strides = [1, 1, 1]} : vector<1x8x384xf32> to vector<1x8x32xf32>
    %10 = vector.extract_strided_slice %6 {offsets = [0, 0, 128], sizes = [1, 8, 32], strides = [1, 1, 1]} : vector<1x8x384xf32> to vector<1x8x32xf32>
    %11 = vector.extract_strided_slice %6 {offsets = [0, 0, 256], sizes = [1, 8, 32], strides = [1, 1, 1]} : vector<1x8x384xf32> to vector<1x8x32xf32>
    "tpu.trace_start"() <{level = 10 : i32, message = "bqd,bkd->bqk"}> : () -> ()
    %cst_8 = arith.constant dense<0.000000e+00> : vector<1x8x8xf32>
    %12 = tpu.matmul %9, %10, %cst_8 {dimension_numbers = #tpu.dot_dimension_numbers<[2], [2], [1], [1], [0, 0, 0, 1, 1, 1], [0], [0]>} : vector<1x8x32xf32>, vector<1x8x32xf32>, vector<1x8x8xf32> -> vector<1x8x8xf32>
    "tpu.trace_stop"() : () -> ()
    %13 = vector.broadcast %8 : vector<1x1x8xf32> to vector<1x8x8xf32>
    %14 = arith.addf %12, %13 : vector<1x8x8xf32>
    %cst_9 = arith.constant dense<0xFF800000> : vector<1x8xf32>
    %15 = vector.multi_reduction <maximumf>, %14, %cst_9 [2] : vector<1x8x8xf32> to vector<1x8xf32>
    %16 = vector.shape_cast %15 : vector<1x8xf32> to vector<1x8x1xf32>
    %17 = vector.broadcast %16 : vector<1x8x1xf32> to vector<1x8x8xf32>
    %18 = arith.subf %14, %17 : vector<1x8x8xf32>
    %19 = math.exp %18 : vector<1x8x8xf32>
    %cst_10 = arith.constant dense<0.000000e+00> : vector<1x8xf32>
    %20 = vector.multi_reduction <add>, %19, %cst_10 [2] : vector<1x8x8xf32> to vector<1x8xf32>
    %21 = vector.shape_cast %20 : vector<1x8xf32> to vector<1x8x1xf32>
    %22 = tpu.reciprocal %21 : vector<1x8x1xf32> -> vector<1x8x1xf32>
    %23 = vector.broadcast %22 : vector<1x8x1xf32> to vector<1x8x8xf32>
    %24 = arith.mulf %19, %23 : vector<1x8x8xf32>
    %25 = vector.shape_cast %24 : vector<1x8x8xf32> to vector<1x1x8x8xf32>
    %c0_11 = arith.constant 0 : index
    %c0_12 = arith.constant 0 : index
    %c0_13 = arith.constant 0 : index
    %c0_14 = arith.constant 0 : index
    %26 = vector.load %arg14[%c0_11, %c0_12, %c0_13, %c0_14] : memref<1x4x8x8xf32, #tpu.memory_space<vmem>>, vector<1x1x8x8xf32>
    tpu.vector_store %arg14[%c0_11, %c0_12, %c0_13, %c0_14], %25 {strides = array<i32>} : memref<1x4x8x8xf32, #tpu.memory_space<vmem>>, vector<1x1x8x8xf32>,
    "tpu.trace_start"() <{level = 10 : i32, message = "bqk,bkd->bqd"}> : () -> ()
    %cst_15 = arith.constant dense<0.000000e+00> : vector<1x8x32xf32>
    %27 = tpu.matmul %24, %11, %cst_15 {dimension_numbers = #tpu.dot_dimension_numbers<[2], [1], [1], [2], [0, 0, 0, 1, 1, 2], [0], [0]>} : vector<1x8x8xf32>, vector<1x8x32xf32>, vector<1x8x32xf32> -> vector<1x8x32xf32>
    "tpu.trace_stop"() : () -> ()
    %28 = vector.extract_strided_slice %6 {offsets = [0, 0, 32], sizes = [1, 8, 32], strides = [1, 1, 1]} : vector<1x8x384xf32> to vector<1x8x32xf32>
    %29 = vector.extract_strided_slice %6 {offsets = [0, 0, 160], sizes = [1, 8, 32], strides = [1, 1, 1]} : vector<1x8x384xf32> to vector<1x8x32xf32>
    %30 = vector.extract_strided_slice %6 {offsets = [0, 0, 288], sizes = [1, 8, 32], strides = [1, 1, 1]} : vector<1x8x384xf32> to vector<1x8x32xf32>
    "tpu.trace_start"() <{level = 10 : i32, message = "bqd,bkd->bqk"}> : () -> ()
    %cst_16 = arith.constant dense<0.000000e+00> : vector<1x8x8xf32>
    %31 = tpu.matmul %28, %29, %cst_16 {dimension_numbers = #tpu.dot_dimension_numbers<[2], [2], [1], [1], [0, 0, 0, 1, 1, 1], [0], [0]>} : vector<1x8x32xf32>, vector<1x8x32xf32>, vector<1x8x8xf32> -> vector<1x8x8xf32>
    "tpu.trace_stop"() : () -> ()
    %32 = vector.broadcast %8 : vector<1x1x8xf32> to vector<1x8x8xf32>
    %33 = arith.addf %31, %32 : vector<1x8x8xf32>
    %cst_17 = arith.constant dense<0xFF800000> : vector<1x8xf32>
    %34 = vector.multi_reduction <maximumf>, %33, %cst_17 [2] : vector<1x8x8xf32> to vector<1x8xf32>
    %35 = vector.shape_cast %34 : vector<1x8xf32> to vector<1x8x1xf32>
    %36 = vector.broadcast %35 : vector<1x8x1xf32> to vector<1x8x8xf32>
    %37 = arith.subf %33, %36 : vector<1x8x8xf32>
    %38 = math.exp %37 : vector<1x8x8xf32>
    %cst_18 = arith.constant dense<0.000000e+00> : vector<1x8xf32>
    %39 = vector.multi_reduction <add>, %38, %cst_18 [2] : vector<1x8x8xf32> to vector<1x8xf32>
    %40 = vector.shape_cast %39 : vector<1x8xf32> to vector<1x8x1xf32>
    %41 = tpu.reciprocal %40 : vector<1x8x1xf32> -> vector<1x8x1xf32>
    %42 = vector.broadcast %41 : vector<1x8x1xf32> to vector<1x8x8xf32>
    %43 = arith.mulf %38, %42 : vector<1x8x8xf32>
    %44 = vector.shape_cast %43 : vector<1x8x8xf32> to vector<1x1x8x8xf32>
    %c0_19 = arith.constant 0 : index
    %c1 = arith.constant 1 : index
    %c0_20 = arith.constant 0 : index
    %c0_21 = arith.constant 0 : index
    %45 = vector.load %arg14[%c0_19, %c1, %c0_20, %c0_21] : memref<1x4x8x8xf32, #tpu.memory_space<vmem>>, vector<1x1x8x8xf32>
    tpu.vector_store %arg14[%c0_19, %c1, %c0_20, %c0_21], %44 {strides = array<i32>} : memref<1x4x8x8xf32, #tpu.memory_space<vmem>>, vector<1x1x8x8xf32>,
    "tpu.trace_start"() <{level = 10 : i32, message = "bqk,bkd->bqd"}> : () -> ()
    %cst_22 = arith.constant dense<0.000000e+00> : vector<1x8x32xf32>
    %46 = tpu.matmul %43, %30, %cst_22 {dimension_numbers = #tpu.dot_dimension_numbers<[2], [1], [1], [2], [0, 0, 0, 1, 1, 2], [0], [0]>} : vector<1x8x8xf32>, vector<1x8x32xf32>, vector<1x8x32xf32> -> vector<1x8x32xf32>
    "tpu.trace_stop"() : () -> ()
    %47 = vector.extract_strided_slice %6 {offsets = [0, 0, 64], sizes = [1, 8, 32], strides = [1, 1, 1]} : vector<1x8x384xf32> to vector<1x8x32xf32>
    %48 = vector.extract_strided_slice %6 {offsets = [0, 0, 192], sizes = [1, 8, 32], strides = [1, 1, 1]} : vector<1x8x384xf32> to vector<1x8x32xf32>
    %49 = vector.extract_strided_slice %6 {offsets = [0, 0, 320], sizes = [1, 8, 32], strides = [1, 1, 1]} : vector<1x8x384xf32> to vector<1x8x32xf32>
    "tpu.trace_start"() <{level = 10 : i32, message = "bqd,bkd->bqk"}> : () -> ()
    %cst_23 = arith.constant dense<0.000000e+00> : vector<1x8x8xf32>
    %50 = tpu.matmul %47, %48, %cst_23 {dimension_numbers = #tpu.dot_dimension_numbers<[2], [2], [1], [1], [0, 0, 0, 1, 1, 1], [0], [0]>} : vector<1x8x32xf32>, vector<1x8x32xf32>, vector<1x8x8xf32> -> vector<1x8x8xf32>
    "tpu.trace_stop"() : () -> ()
    %51 = vector.broadcast %8 : vector<1x1x8xf32> to vector<1x8x8xf32>
    %52 = arith.addf %50, %51 : vector<1x8x8xf32>
    %cst_24 = arith.constant dense<0xFF800000> : vector<1x8xf32>
    %53 = vector.multi_reduction <maximumf>, %52, %cst_24 [2] : vector<1x8x8xf32> to vector<1x8xf32>
    %54 = vector.shape_cast %53 : vector<1x8xf32> to vector<1x8x1xf32>
    %55 = vector.broadcast %54 : vector<1x8x1xf32> to vector<1x8x8xf32>
    %56 = arith.subf %52, %55 : vector<1x8x8xf32>
    %57 = math.exp %56 : vector<1x8x8xf32>
    %cst_25 = arith.constant dense<0.000000e+00> : vector<1x8xf32>
    %58 = vector.multi_reduction <add>, %57, %cst_25 [2] : vector<1x8x8xf32> to vector<1x8xf32>
    %59 = vector.shape_cast %58 : vector<1x8xf32> to vector<1x8x1xf32>
    %60 = tpu.reciprocal %59 : vector<1x8x1xf32> -> vector<1x8x1xf32>
    %61 = vector.broadcast %60 : vector<1x8x1xf32> to vector<1x8x8xf32>
    %62 = arith.mulf %57, %61 : vector<1x8x8xf32>
    %63 = vector.shape_cast %62 : vector<1x8x8xf32> to vector<1x1x8x8xf32>
    %c0_26 = arith.constant 0 : index
    %c2 = arith.constant 2 : index
    %c0_27 = arith.constant 0 : index
    %c0_28 = arith.constant 0 : index
    %64 = vector.load %arg14[%c0_26, %c2, %c0_27, %c0_28] : memref<1x4x8x8xf32, #tpu.memory_space<vmem>>, vector<1x1x8x8xf32>
    tpu.vector_store %arg14[%c0_26, %c2, %c0_27, %c0_28], %63 {strides = array<i32>} : memref<1x4x8x8xf32, #tpu.memory_space<vmem>>, vector<1x1x8x8xf32>,
    "tpu.trace_start"() <{level = 10 : i32, message = "bqk,bkd->bqd"}> : () -> ()
    %cst_29 = arith.constant dense<0.000000e+00> : vector<1x8x32xf32>
    %65 = tpu.matmul %62, %49, %cst_29 {dimension_numbers = #tpu.dot_dimension_numbers<[2], [1], [1], [2], [0, 0, 0, 1, 1, 2], [0], [0]>} : vector<1x8x8xf32>, vector<1x8x32xf32>, vector<1x8x32xf32> -> vector<1x8x32xf32>
    "tpu.trace_stop"() : () -> ()
    %66 = vector.extract_strided_slice %6 {offsets = [0, 0, 96], sizes = [1, 8, 32], strides = [1, 1, 1]} : vector<1x8x384xf32> to vector<1x8x32xf32>
    %67 = vector.extract_strided_slice %6 {offsets = [0, 0, 224], sizes = [1, 8, 32], strides = [1, 1, 1]} : vector<1x8x384xf32> to vector<1x8x32xf32>
    %68 = vector.extract_strided_slice %6 {offsets = [0, 0, 352], sizes = [1, 8, 32], strides = [1, 1, 1]} : vector<1x8x384xf32> to vector<1x8x32xf32>
    "tpu.trace_start"() <{level = 10 : i32, message = "bqd,bkd->bqk"}> : () -> ()
    %cst_30 = arith.constant dense<0.000000e+00> : vector<1x8x8xf32>
    %69 = tpu.matmul %66, %67, %cst_30 {dimension_numbers = #tpu.dot_dimension_numbers<[2], [2], [1], [1], [0, 0, 0, 1, 1, 1], [0], [0]>} : vector<1x8x32xf32>, vector<1x8x32xf32>, vector<1x8x8xf32> -> vector<1x8x8xf32>
    "tpu.trace_stop"() : () -> ()
    %70 = vector.broadcast %8 : vector<1x1x8xf32> to vector<1x8x8xf32>
    %71 = arith.addf %69, %70 : vector<1x8x8xf32>
    %cst_31 = arith.constant dense<0xFF800000> : vector<1x8xf32>
    %72 = vector.multi_reduction <maximumf>, %71, %cst_31 [2] : vector<1x8x8xf32> to vector<1x8xf32>
    %73 = vector.shape_cast %72 : vector<1x8xf32> to vector<1x8x1xf32>
    %74 = vector.broadcast %73 : vector<1x8x1xf32> to vector<1x8x8xf32>
    %75 = arith.subf %71, %74 : vector<1x8x8xf32>
    %76 = math.exp %75 : vector<1x8x8xf32>
    %cst_32 = arith.constant dense<0.000000e+00> : vector<1x8xf32>
    %77 = vector.multi_reduction <add>, %76, %cst_32 [2] : vector<1x8x8xf32> to vector<1x8xf32>
    %78 = vector.shape_cast %77 : vector<1x8xf32> to vector<1x8x1xf32>
    %79 = tpu.reciprocal %78 : vector<1x8x1xf32> -> vector<1x8x1xf32>
    %80 = vector.broadcast %79 : vector<1x8x1xf32> to vector<1x8x8xf32>
    %81 = arith.mulf %76, %80 : vector<1x8x8xf32>
    %82 = vector.shape_cast %81 : vector<1x8x8xf32> to vector<1x1x8x8xf32>
    %c0_33 = arith.constant 0 : index
    %c3 = arith.constant 3 : index
    %c0_34 = arith.constant 0 : index
    %c0_35 = arith.constant 0 : index
    %83 = vector.load %arg14[%c0_33, %c3, %c0_34, %c0_35] : memref<1x4x8x8xf32, #tpu.memory_space<vmem>>, vector<1x1x8x8xf32>
    tpu.vector_store %arg14[%c0_33, %c3, %c0_34, %c0_35], %82 {strides = array<i32>} : memref<1x4x8x8xf32, #tpu.memory_space<vmem>>, vector<1x1x8x8xf32>,
    "tpu.trace_start"() <{level = 10 : i32, message = "bqk,bkd->bqd"}> : () -> ()
    %cst_36 = arith.constant dense<0.000000e+00> : vector<1x8x32xf32>
    %84 = tpu.matmul %81, %68, %cst_36 {dimension_numbers = #tpu.dot_dimension_numbers<[2], [1], [1], [2], [0, 0, 0, 1, 1, 2], [0], [0]>} : vector<1x8x8xf32>, vector<1x8x32xf32>, vector<1x8x32xf32> -> vector<1x8x32xf32>
    "tpu.trace_stop"() : () -> ()
    %85 = tpu.concatenate %27, %46, %65, %84 in 2 : vector<1x8x32xf32>, vector<1x8x32xf32>, vector<1x8x32xf32>, vector<1x8x32xf32> -> vector<1x8x128xf32>
    %86 = vector.shape_cast %85 : vector<1x8x128xf32> to vector<8x128xf32>
    %c0_37 = arith.constant 0 : index
    %c0_38 = arith.constant 0 : index
    %87 = vector.load %arg6[%c0_37, %c0_38] : memref<1x32xf32, #tpu.memory_space<vmem>>, vector<1x32xf32>
    %88 = vector.broadcast %87 : vector<1x32xf32> to vector<8x32xf32>
    %89 = arith.addf %0, %88 : vector<8x32xf32>
    %c0_39 = arith.constant 0 : index
    %c0_40 = arith.constant 0 : index
    %90 = vector.load %arg5[%c0_39, %c0_40] : memref<128x32xf32, #tpu.memory_space<vmem>>, vector<128x32xf32>
    %cst_41 = arith.constant dense<0.000000e+00> : vector<8x32xf32>
    %91 = tpu.matmul %86, %90, %cst_41 {dimension_numbers = #tpu.dot_dimension_numbers<[1], [0], [0], [1], [0, 0, 1, 1], [], []>} : vector<8x128xf32>, vector<128x32xf32>, vector<8x32xf32> -> vector<8x32xf32>
    %92 = arith.addf %89, %91 : vector<8x32xf32>
    %cst_42 = arith.constant dense<0.000000e+00> : vector<8xf32>
    %93 = vector.multi_reduction <add>, %92, %cst_42 [1] : vector<8x32xf32> to vector<8xf32>
    %94 = vector.shape_cast %93 : vector<8xf32> to vector<8x1xf32>
    %cst_43 = arith.constant 3.200000e+01 : f32
    %95 = vector.broadcast %cst_43 : f32 to vector<8x1xf32>
    %96 = arith.divf %94, %95 : vector<8x1xf32>
    %97 = vector.broadcast %96 : vector<8x1xf32> to vector<8x32xf32>
    %98 = arith.subf %92, %97 : vector<8x32xf32>
    %99 = arith.mulf %98, %98 : vector<8x32xf32>
    %cst_44 = arith.constant dense<0.000000e+00> : vector<8xf32>
    %100 = vector.multi_reduction <add>, %99, %cst_44 [1] : vector<8x32xf32> to vector<8xf32>
    %101 = vector.shape_cast %100 : vector<8xf32> to vector<8x1xf32>
    %cst_45 = arith.constant 3.200000e+01 : f32
    %102 = vector.broadcast %cst_45 : f32 to vector<8x1xf32>
    %103 = arith.divf %101, %102 : vector<8x1xf32>
    %cst_46 = arith.constant 9.99999974E-6 : f32
    %104 = vector.broadcast %cst_46 : f32 to vector<8x1xf32>
    %105 = arith.addf %103, %104 : vector<8x1xf32>
    %106 = math.rsqrt %105 : vector<8x1xf32>
    %107 = vector.broadcast %106 : vector<8x1xf32> to vector<8x32xf32>
    %108 = arith.mulf %98, %107 : vector<8x32xf32>
    %c0_47 = arith.constant 0 : index
    %c0_48 = arith.constant 0 : index
    %109 = vector.load %arg7[%c0_47, %c0_48] : memref<1x32xf32, #tpu.memory_space<vmem>>, vector<1x32xf32>
    %110 = vector.broadcast %109 : vector<1x32xf32> to vector<8x32xf32>
    %111 = arith.mulf %108, %110 : vector<8x32xf32>
    %c0_49 = arith.constant 0 : index
    %c0_50 = arith.constant 0 : index
    %112 = vector.load %arg8[%c0_49, %c0_50] : memref<1x32xf32, #tpu.memory_space<vmem>>, vector<1x32xf32>
    %113 = vector.broadcast %112 : vector<1x32xf32> to vector<8x32xf32>
    %114 = arith.addf %111, %113 : vector<8x32xf32>
    %c0_51 = arith.constant 0 : index
    %c0_52 = arith.constant 0 : index
    %115 = vector.load %arg9[%c0_51, %c0_52] : memref<32x128xf32, #tpu.memory_space<vmem>>, vector<32x128xf32>
    %cst_53 = arith.constant dense<0.000000e+00> : vector<8x128xf32>
    %116 = tpu.matmul %114, %115, %cst_53 {dimension_numbers = #tpu.dot_dimension_numbers<[1], [0], [0], [1], [0, 0, 1, 1], [], []>} : vector<8x32xf32>, vector<32x128xf32>, vector<8x128xf32> -> vector<8x128xf32>
    %c0_54 = arith.constant 0 : index
    %c0_55 = arith.constant 0 : index
    %117 = vector.load %arg10[%c0_54, %c0_55] : memref<1x128xf32, #tpu.memory_space<vmem>>, vector<1x128xf32>
    %118 = vector.broadcast %117 : vector<1x128xf32> to vector<8x128xf32>
    %119 = arith.addf %116, %118 : vector<8x128xf32>
    %cst_56 = arith.constant 0.000000e+00 : f32
    %120 = vector.broadcast %cst_56 : f32 to vector<8x128xf32>
    %121 = arith.maximumf %119, %120 : vector<8x128xf32>
    %c0_57 = arith.constant 0 : index
    %c0_58 = arith.constant 0 : index
    %122 = vector.load %arg11[%c0_57, %c0_58] : memref<128x32xf32, #tpu.memory_space<vmem>>, vector<128x32xf32>
    %cst_59 = arith.constant dense<0.000000e+00> : vector<8x32xf32>
    %123 = tpu.matmul %121, %122, %cst_59 {dimension_numbers = #tpu.dot_dimension_numbers<[1], [0], [0], [1], [0, 0, 1, 1], [], []>} : vector<8x128xf32>, vector<128x32xf32>, vector<8x32xf32> -> vector<8x32xf32>
    %c0_60 = arith.constant 0 : index
    %c0_61 = arith.constant 0 : index
    %124 = vector.load %arg12[%c0_60, %c0_61] : memref<1x32xf32, #tpu.memory_space<vmem>>, vector<1x32xf32>
    %125 = vector.broadcast %124 : vector<1x32xf32> to vector<8x32xf32>
    %126 = arith.addf %123, %125 : vector<8x32xf32>
    %c0_62 = arith.constant 0 : index
    %c0_63 = arith.constant 0 : index
    %127 = vector.load %arg13[%c0_62, %c0_63] : memref<8x32xf32, #tpu.memory_space<vmem>>, vector<8x32xf32>
    tpu.vector_store %arg13[%c0_62, %c0_63], %126 {strides = array<i32>} : memref<8x32xf32, #tpu.memory_space<vmem>>, vector<8x32xf32>,
    return
  }
  func.func @transform_0(%arg0: i32) -> (i32, i32) {
    %c0_i32 = arith.constant 0 : i32
    %c0_i32_0 = arith.constant 0 : i32
    return %arg0, %c0_i32 : i32, i32
  }
  func.func @transform_1(%arg0: i32) -> (i32, i32, i32) {
    %c0_i32 = arith.constant 0 : i32
    %c0_i32_0 = arith.constant 0 : i32
    %c0_i32_1 = arith.constant 0 : i32
    return %arg0, %c0_i32, %c0_i32_0 : i32, i32, i32
  }
  func.func @transform_2(%arg0: i32) -> (i32, i32) {
    %c0_i32 = arith.constant 0 : i32
    %c0_i32_0 = arith.constant 0 : i32
    %c0_i32_1 = arith.constant 0 : i32
    return %c0_i32, %c0_i32_0 : i32, i32
  }
  func.func @transform_3(%arg0: i32) -> (i32, i32) {
    %c0_i32 = arith.constant 0 : i32
    %c0_i32_0 = arith.constant 0 : i32
    %c0_i32_1 = arith.constant 0 : i32
    return %c0_i32, %c0_i32_0 : i32, i32
  }
  func.func @transform_4(%arg0: i32) -> (i32, i32) {
    %c0_i32 = arith.constant 0 : i32
    %c0_i32_0 = arith.constant 0 : i32
    %c0_i32_1 = arith.constant 0 : i32
    return %c0_i32, %c0_i32_0 : i32, i32
  }
  func.func @transform_5(%arg0: i32) -> (i32, i32) {
    %c0_i32 = arith.constant 0 : i32
    %c0_i32_0 = arith.constant 0 : i32
    %c0_i32_1 = arith.constant 0 : i32
    return %c0_i32, %c0_i32_0 : i32, i32
  }
  func.func @transform_6(%arg0: i32) -> (i32, i32) {
    %c0_i32 = arith.constant 0 : i32
    %c0_i32_0 = arith.constant 0 : i32
    %c0_i32_1 = arith.constant 0 : i32
    return %c0_i32, %c0_i32_0 : i32, i32
  }
  func.func @transform_7(%arg0: i32) -> (i32, i32) {
    %c0_i32 = arith.constant 0 : i32
    %c0_i32_0 = arith.constant 0 : i32
    %c0_i32_1 = arith.constant 0 : i32
    return %c0_i32, %c0_i32_0 : i32, i32
  }
  func.func @transform_8(%arg0: i32) -> (i32, i32) {
    %c0_i32 = arith.constant 0 : i32
    %c0_i32_0 = arith.constant 0 : i32
    %c0_i32_1 = arith.constant 0 : i32
    return %c0_i32, %c0_i32_0 : i32, i32
  }
  func.func @transform_9(%arg0: i32) -> (i32, i32) {
    %c0_i32 = arith.constant 0 : i32
    %c0_i32_0 = arith.constant 0 : i32
    %c0_i32_1 = arith.constant 0 : i32
    return %c0_i32, %c0_i32_0 : i32, i32
  }
  func.func @transform_10(%arg0: i32) -> (i32, i32) {
    %c0_i32 = arith.constant 0 : i32
    %c0_i32_0 = arith.constant 0 : i32
    %c0_i32_1 = arith.constant 0 : i32
    return %c0_i32, %c0_i32_0 : i32, i32
  }
  func.func @transform_11(%arg0: i32) -> (i32, i32) {
    %c0_i32 = arith.constant 0 : i32
    %c0_i32_0 = arith.constant 0 : i32
    %c0_i32_1 = arith.constant 0 : i32
    return %c0_i32, %c0_i32_0 : i32, i32
  }
  func.func @transform_12(%arg0: i32) -> (i32, i32) {
    %c0_i32 = arith.constant 0 : i32
    %c0_i32_0 = arith.constant 0 : i32
    return %arg0, %c0_i32 : i32, i32
  }
  func.func @transform_13(%arg0: i32) -> (i32, i32, i32, i32) {
    %c0_i32 = arith.constant 0 : i32
    %c0_i32_0 = arith.constant 0 : i32
    %c0_i32_1 = arith.constant 0 : i32
    %c0_i32_2 = arith.constant 0 : i32
    return %arg0, %c0_i32, %c0_i32_0, %c0_i32_1 : i32, i32, i32, i32
  }
}

</mosaic_0001>

<bundles_post_ra>
// kernel: tpu_custom_call.1
= control target key start
LH: loop header
LB: loop body
LE: loop exit
PB: predicated region body
PF: predicated region fallthrough
CT: control target
= control target key end

     0   :  { %s2735_s0 = inlined_call_operand.vmem [shape: f32[16,32], index: 0, kind: input, shape index: {}]   ;;  %s2736_s1 = inlined_call_operand.vmem [shape: bf16[2,1,8], index: 1, kind: input, shape index: {}]   ;;  %s2737_s2 = inlined_call_operand.vmem [shape: f32[32,384], index: 2, kind: input, shape index: {}]   ;;  %s2738_s3 = inlined_call_operand.vmem [shape: f32[1,384], index: 3, kind: input, shape index: {}]   ;;  %s2739_s4 = inlined_call_operand.vmem [shape: f32[128,32], index: 4, kind: input, shape index: {}]   ;;  %s2740_s5 = inlined_call_operand.vmem [shape: f32[1,32], index: 5, kind: input, shape index: {}]   ;;  %s2741_s6 = inlined_call_operand.vmem [shape: f32[1,32], index: 6, kind: input, shape index: {}]   ;;  %s2742_s7 = inlined_call_operand.vmem [shape: f32[1,32], index: 7, kind: input, shape index: {}]   ;;  %s2743_s8 = inlined_call_operand.vmem [shape: f32[32,128], index: 8, kind: input, shape index: {}]   ;;  %s2744_s9 = inlined_call_operand.vmem [shape: f32[1,128], index: 9, kind: input, shape index: {}]   ;;  %s2745_s10 = inlined_call_operand.vmem [shape: f32[128,32], index: 10, kind: input, shape index: {}]   ;;  %s2746_s11 = inlined_call_operand.vmem [shape: f32[1,32], index: 11, kind: input, shape index: {}]   ;;  %s2747_s12 = inlined_call_operand.hbm [shape: f32[16,32], index: 12, kind: output, shape index: {0}]   ;;  %s2748_s13 = inlined_call_operand.hbm [shape: f32[2,4,8,8], index: 13, kind: output, shape index: {1}]  }
   0x1   :  { %2755 = sst [smem:[#allocation10_spill]] %s2735_s0 }
   0x2   :  { %2756 = sst [smem:[#allocation11_spill]] %s2736_s1 }
   0x3   :  { %2757 = sst [smem:[#allocation12_spill]] %s2737_s2 }
   0x4   :  { %2758 = sst [smem:[#allocation13_spill]] %s2738_s3 }
   0x5   :  { %2759 = sst [smem:[#allocation14_spill]] %s2739_s4 }
   0x6   :  { %19 = vsyncpa [#allocation3], 0 }
   0x7   :  { %21 = vsyncpa [#allocation3 + $0x1], 0 }
   0x8   :  { %22 = vsyncpa [#allocation5], 0 }
   0x9   :  { %24 = vsyncpa [#allocation5 + $0x1], 0  ;;  %s2306_s25 = smov 0   ;;  %s2308_s26 = smov 0  }
   0xa   :  { %s2310_s27 = smov 0   ;;  %s2312_s28 = smov 0  }
   0xb LB: > { %2760 = sst [smem:[#allocation8_spill]] %s2220_s27  ;;  %s2327_s29 = sadd.s32 4294967295, %s2224_s28   ;;  %s2224_s28 = sphi %s2312_s28, %s2776_s28   ;;  %s2220_s27 = sphi %s2310_s27, %s2773_s27   ;;  %s2216_s26 = sphi %s2308_s26, %s2775_s26   ;;  %s2212_s25 = sphi %s2306_s25, %s2774_s25  }
   0xc   : > { %s1762_s30 = sadd.s32 4294967294, %s2224_s28   ;;  %s2331_s14 = sadd.s32 1, %s2224_s28  }
   0xd   : > { %s299_s15 = sadd.s32 1, %s2220_s27  ;;  %s296_s16 = ssub.s32 %s2224_s28, %s2331_s14 }
   0xe   : > { %p309_p0 = scmp.ne.s32.totalorder %s2220_s27, %s2216_s26  ;;  %p297_p1 = scmp.eq.s32.totalorder %s296_s16, 0 }
   0xf   : > { %p310_p2 = scmp.eq.s32.totalorder %s2327_s29, 1  ;;  %p315_p3 = scmp.ne.s32.totalorder %s2216_s26, %s2212_s25 }
  0x10   : > { %p316_p4 = scmp.eq.s32.totalorder %s1762_s30, 1  ;;  %p1765_p7 = scmp.ge.s32.totalorder %s2224_s28, 1 }
  0x11   : > { %s2342_s17 = scalar_select %p297_p1, %s2220_s27, %s299_s15  }
  0x12   : > { %p2344_p5 = por %p310_p2, %p309_p0  ;;  %p2348_p6 = por %p316_p4, %p315_p3 }
  0x13   : > { %2761 = sst [smem:[#allocation9_spill]] %s2342_s17  ;;  %p403_p8 = scmp.lt.s32.totalorder %s2224_s28, 3 }
  0x15   : > { %p404_p9 = pnand %p1765_p7, %p403_p8 }
  0x16   : > { %s2764_s2 = sld [smem:[#allocation12_spill]] (!%p404_p9)  ;;  %p454_p10 = scmp.lt.s32.totalorder (!%p404_p9), %s2327_s29, 1  ;;  %v2226_v7 = vmov (!%p404_p9), 0.0   ;;  %vm491_vm0 = vcmask (!%p404_p9), 261120   ;;  %vm2227_vm1 = vmmov (!%p404_p9), 0   ;;  %v476_v14 = vlaneseq (!%p404_p9) }
  0x17   : > { %407 = sbr.rel (%p404_p9) target bundleno = 2669 (0xa6d), region = 68  ;;  %559 = vmatprep.mubr.f32.mxu0 (!%p404_p9), %v2226_v7  ;;  %s2765_s0 = sld [smem:[#allocation10_spill]] (!%p404_p9)  ;;  %1868 = vmatprep.mubr.msk.f32.mxu1 (!%p404_p9), %vm2227_vm1, %v2226_v7  ;;  %v2231_v28 = vmov (!%p404_p9), 0.0|0.0   ;;  %vm718_vm2 = vcmask (!%p404_p9), 64512   ;;  %vm1319_vm3 = vcmask (!%p404_p9), 523264   ;;  %vm1321_vm4 = vcmask (!%p404_p9), 785408  }
  0x18   : > { %v477_v15 = vshrl.u32 (!%p404_p9), %v476_v14, 7  ;;  %s2766_s3 = sld [smem:[#allocation13_spill]] (!%p404_p9)  ;;  %s2750_s23 = smov (!%p404_p9), 96   ;;  %2000 = vmatprep.subr.bf16.mxu1 (!%p404_p9), %v2231_v28 }
  0x19   : > { %s2752_s24 = smov (!%p404_p9), 64   ;;  %s2754_s30 = smov (!%p404_p9), 32  }
  0x1a   : > { %v482_v16 = vsub.s32 (!%p404_p9), 1, %v477_v15  ;;  %v478_v18 = vsub.s32 (!%p404_p9), 0, %v477_v15  ;;  %s2767_s1 = sld [smem:[#allocation11_spill]] (!%p404_p9)  ;;  %v486_v44 = vsub.s32 (!%p404_p9), 2, %v477_v15  ;;  %s2769_s21 = smov (!%p404_p9), 96  }
  0x1b   : > { %s2770_s4 = sld [smem:[#allocation14_spill]] (!%p404_p9) }
  0x1c   : > { %v463_v0 = vld [vmem:[%s2764_s2 + $0x8] sm:$0xff] (!%p404_p9)  ;;  %v466_v1 = vld [vmem:[%s2764_s2 + $0x20] sm:$0xff] (!%p404_p9)  ;;  %v465_v4 = vld [vmem:[%s2764_s2 + $0x18] sm:$0xff] (!%p404_p9) }
  0x1d   : > { %v462_v2 = vld [vmem:[%s2764_s2] sm:$0xff] (!%p404_p9)  ;;  %v1992_v3 = vpack.c.bf16 (!%p404_p9), %v466_v1, %v463_v0  ;;  %v469_v5 = vld [vmem:[%s2764_s2 + $0x38] sm:$0xff] (!%p404_p9)  ;;  %v472_v6 = vld [vmem:[%s2764_s2 + $0x50] sm:$0xff] (!%p404_p9) }
  0x1e   : > { %v1994_v8 = vpack.c.bf16 %v465_v4, %v462_v2  ;;  %v1996_v9 = vpack.c.bf16 %v472_v6, %v469_v5  ;;  %v468_v10 = vld [vmem:[%s2764_s2 + $0x30] sm:$0xff]  ;;  %v471_v11 = vld [vmem:[%s2764_s2 + $0x48] sm:$0xff]  ;;  %s2381_s15 = scalar_select %p454_p10, %s2327_s29, 1  ;;  %v474_v17 = vld [vmem:[%s2766_s3] sm:$0x7] }
  0x1f   : > { %1993 = vmatprep.subr.bf16.mxu0 %v1992_v3  ;;  %v1998_v12 = vpack.c.bf16 %v471_v11, %v468_v10  ;;  %v483_v19 = vrot.slane %v474_v17, %v482_v16  ;;  %v479_v21 = vrot.slane %v474_v17, %v478_v18  ;;  %v464_v25 = vld [vmem:[%s2764_s2 + $0x10] sm:$0xff]  ;;  %v467_v26 = vld [vmem:[%s2764_s2 + $0x28] sm:$0xff]  ;;  %v470_v27 = vld [vmem:[%s2764_s2 + $0x40] sm:$0xff]  ;;  %v487_v45 = vrot.slane %v474_v17, %v486_v44 }
  0x20   : > { %1995 = vmatpush1.bf16.msra.mxu0 %v1994_v8  ;;  %s1768_s27 = sshll.u32 %s2381_s15, 3  ;;  %v2001_v29 = vpack.c.bf16 %v467_v26, %v464_v25  ;;  %v473_v30 = vld [vmem:[%s2764_s2 + $0x58] sm:$0xff]  ;;  %s460_s16 = scalar_lea.vmem %s2767_s1, %s2381_s15 }
  0x21   : > { %1997 = vmatprep.subr.bf16.mxu0 %v1996_v9  ;;  %s457_s20 = scalar_lea.vmem %s2765_s0, %s1768_s27  ;;  %v2004_v31 = vpack.c.bf16 %v473_v30, %v470_v27  ;;  %v636_v32 = vld [vmem:[%s460_s16] sm:$0x1]  ;;  %s2768_s15 = smov 64  }
  0x22   : > { %v2387_v13 = vld [vmem:[%s457_s20] sm:$0xff]  ;;  %2002 = vmatpush3.bf16.msra.mxu1 %v2001_v29  ;;  %v637_v33 = vunpack.c.l.bf16 %v636_v32  ;;  %s2232_s1 = smov [#allocation4]  }
  0x23   : > { %2003 = vmatprep.subr.bf16.mxu1 %v2231_v28  ;;  %v1335_v44 = vld [vmem:[%s2770_s4 + $0x20] sm:$0xff]  ;;  %s2134_s16 = sshll.u32 %s2232_s1, 4  ;;  %s2135_s16 = int_to_ptr.vmem [resolvable:$false] %s2134_s16 }
  0x24   : > { %1999 = vmatpush1.bf16.msra.mxu0 %v1998_v12  ;;  %v2432_v34 = vrot.slane %v637_v33, %v478_v18 }
  0x25   : > { %1871 = vmatprep.subr.mxu0 %v2226_v7 }
  0x26   : > { %2005 = vmatpush3.bf16.msra.mxu1 %v2004_v31 }
  0x27   : > { %1769 = vmatmul.mubr.msk.f32.vlgmr.msra.gmra.mrb[0].mxu0 %vm491_vm0, %v2387_v13  ;;  %1886 = vmatprep.subr.mxu1 %v2226_v7 }
  0x28   : > { %1873 = vmatprep.mubr.msk.f32.mxu0 %vm2227_vm1, %v2226_v7 }
  0x29   : > { %1869 = vmatmul.mubr.msk.f32.vlgmr.msra.gmra.mrb[0].mxu1 %vm491_vm0, %v2387_v13 }
  0x2a   : > { %1888 = vmatprep.mubr.msk.f32.mxu1 %vm2227_vm1, %v2226_v7 }
  0xfa   : > { %v561_v20 = vpop.f32.mrb[0].mxu0 }
  0xfb   : > { %v563_v22 = vpop.f32.mrb[1].mxu0  ;;  %v562_v24 = vadd.f32 %v561_v20, %v479_v21 }
  0xfc   : > { %v564_v23 = vadd.f32 %v563_v22, %v483_v19  ;;  %v632_v46 = vpop.f32.mrb[0].mxu1 }
  0xfd   : > { %v2437_v47 = vadd.f32 %v632_v46, %v487_v45  ;;  %v1870_v48 = vpop.f32.mrb[1].mxu1  ;;  %v1336_v45 = vld [vmem:[%s2770_s4 + $0x28] sm:$0xff] }
  0xfe   : > { %806 = vrot.lane.b32.xlu1 %v564_v23, %s2750_s23  ;;  %1872 = vmatpush3.xpose.msk.msra.mxu0 %vm491_vm0, %v564_v23  ;;  %v2013_v46 = vpack.c.bf16 %v1336_v45, %v1335_v44  ;;  %v1337_v48 = vld [vmem:[%s2770_s4 + $0x30] sm:$0xff]  ;;  %v1537_v44 = vld [vmem:[%s2745_s10 + $0x20] sm:$0xff]  ;;  %v1538_v45 = vld [vmem:[%s2745_s10 + $0x28] sm:$0xff] }
  0xff   : > { %1876 = vmatprep.subr.mxu0 %v2226_v7 }
 0x101   : > { %1874 = vmatmul.mubr.msk.f32.vlgmr.msra.gmra.mrb[2].mxu0 %vm491_vm0, %v562_v24 }
 0x102   : > { %804 = vrot.lane.b32.xlu1 %v562_v24, %s2750_s23  ;;  %1878 = vmatprep.mubr.msk.f32.mxu0 %vm2227_vm1, %v2226_v7  ;;  %s2443_s23 = sand.u32 1, %s2216_s26  }
 0x103   : > { %1877 = vmatpush3.msra.mxu0 %v2437_v47 }
 0x104   : > { %1881 = vmatprep.subr.mxu0 %v2226_v7 }
 0x106   : > { %972 = vrot.lane.b32.xlu1 %v562_v24, %s2752_s24  ;;  %s1767_s24 = sshll.u32 %s2443_s23, 5 }
 0x107   : > { %s2447_s20 = scalar_lea.vmem [#allocation4], %s1767_s24  ;;  %s2771_s24 = smov 32  }
 0x108   : > { %s1659_s2 = sshll.u32 %s2447_s20, 4  ;;  %s2652_s2 = int_to_ptr.vmem [resolvable:$true] %s1659_s2 }
 0x109   : > { %s2130_s0 = scalar_lea.vmem %s2652_s2, 512  ;;  %p2137_p0 = scmp.lt.s32.totalorder %s2652_s2, %s2135_s16 }
 0x10a   : > { %1141 = vrot.lane.b32.xlu1 %v564_v23, %s2754_s30  ;;  %p2131_p11 = scmp.ne.s32.totalorder %s2652_s2, %s2130_s0 }
 0x10c   : > { %p2132_p12 = pnand %p2131_p11, %p2344_p5 }
 0x10e   : > { %1139 = vrot.lane.b32.xlu1 %v562_v24, %s2754_s30  ;;  %p2133_p13 = pneg %p2132_p12 }
 0x170   : > { %v807_v50 = vpop.permute.xlu1 %806 }
 0x174   : > { %v805_v51 = vpop.permute.xlu1 %804 }
 0x178   : > { %v973_v54 = vpop.permute.xlu1 %972 }
 0x17c   : > { %v1142_v56 = vpop.permute.xlu1 %1141 }
 0x180   : > { %v1140_v57 = vpop.permute.xlu1 %1139 }
 0x1d4   : > { %v714_v35 = vpop.f32.mrb[2].mxu0 }
 0x1d5   : > { %v715_v36 = vadd.f32 %v714_v35, %v2432_v34  ;;  %v1875_v37 = vpop.f32.mrb[3].mxu0 }
 0x1d7   : > { %v719_v38 = vsel %vm718_vm2, %v715_v36, -inf }
 0x1d8   : > { %720 = vmax.xlane.f32.xlu0 %v719_v38  ;;  %v1331_v38 = vld [vmem:[%s2770_s4] sm:$0xff] }
 0x265   : > { %v721_v39 = vpop.xlane.xlu0 %720 }
 0x266   : > { %v722_v40 = vsub.f32 %v715_v36, %v721_v39  ;;  %v1332_v39 = vld [vmem:[%s2770_s4 + $0x8] sm:$0xff] }
 0x268   : > { %v723_v41 = vmul.f32 1.442695, %v722_v40  ;;  %v1333_v40 = vld [vmem:[%s2770_s4 + $0x10] sm:$0xff] }
 0x26a   : > { %2112 = vpow2.f32 %v723_v41  ;;  %v2007_v41 = vpack.c.bf16 %v1332_v39, %v1331_v38 }
 0x274   : > { %v2113_v42 = vpop.eup %2112 }
 0x275   : > { %v725_v43 = vsel %vm718_vm2, %v2113_v42, 0.0 }
 0x276   : > { %726 = vadd.xlane.f32.xlu0 %v725_v43 }
 0x28c   : > { %974 = vrot.lane.b32.xlu0 %v564_v23, %s2768_s15 }
 0x303   : > { %v727_v49 = vpop.xlane.xlu0 %726 }
 0x304   : > { %2114 = vrcp.f32 %v727_v49  ;;  %v1338_v49 = vld [vmem:[%s2770_s4 + $0x38] sm:$0xff] }
 0x307   : > { %v975_v55 = vpop.permute.xlu0 %974 }
 0x30e   : > { %v2115_v52 = vpop.eup %2114 }
 0x30f   : > { %v729_v53 = vmul.f32 %v2115_v52, %v2113_v42  ;;  %v1334_v42 = vld [vmem:[%s2770_s4 + $0x18] sm:$0xff] }
 0x310   : > { %v2010_v43 = vpack.c.bf16 %v1334_v42, %v1333_v40  ;;  %v1536_v42 = vld [vmem:[%s2745_s10 + $0x18] sm:$0xff] }
 0x311   : > { %1879 = vmatmul.mubr.msk.f32.vlgmr.msra.gmra.mrb[4].mxu0 %vm718_vm2, %v729_v53  ;;  %730 = vst.msk [vmem:[%s2447_s20] sm:$0xff] %vm718_vm2, %v729_v53  ;;  %v1339_v53 = vld [vmem:[%s2770_s4 + $0x40] sm:$0xff] }
 0x312   : > { %1882 = vmatpush3.xpose.msk.msra.mxu0 %vm491_vm0, %v807_v50  ;;  %1883 = vmatprep.mubr.msk.f32.mxu0 %vm2227_vm1, %v2226_v7 }
 0x313   : > { %1891 = vmatprep.subr.mxu0 %v2226_v7 }
 0x315   : > { %1884 = vmatmul.mubr.msk.f32.vlgmr.msra.gmra.mrb[6].mxu0 %vm491_vm0, %v805_v51  ;;  %v2016_v51 = vpack.c.bf16 %v1338_v49, %v1337_v48  ;;  %v1541_v49 = vld [vmem:[%s2745_s10 + $0x40] sm:$0xff] }
 0x316   : > { %1892 = vmatpush3.xpose.msk.msra.mxu0 %vm491_vm0, %v975_v55  ;;  %1893 = vmatprep.mubr.msk.f32.mxu0 %vm2227_vm1, %v2226_v7 }
 0x317   : > { %1901 = vmatprep.subr.mxu0 %v2226_v7 }
 0x319   : > { %1894 = vmatmul.mubr.msk.f32.vlgmr.msra.gmra.mrb[8].mxu0 %vm491_vm0, %v973_v54  ;;  %v1340_v54 = vld [vmem:[%s2770_s4 + $0x48] sm:$0xff] }
 0x31a   : > { %1902 = vmatpush3.xpose.msk.msra.mxu0 %vm491_vm0, %v1142_v56  ;;  %1903 = vmatprep.mubr.msk.f32.mxu0 %vm2227_vm1, %v2226_v7  ;;  %v2019_v56 = vpack.c.bf16 %v1340_v54, %v1339_v53  ;;  %v1544_v53 = vld [vmem:[%s2745_s10 + $0x58] sm:$0xff] }
 0x31b   : > { %2006 = vmatprep.subr.bf16.mxu0 %v2231_v28 }
 0x31d   : > { %1904 = vmatmul.mubr.msk.f32.vlgmr.msra.gmra.mrb[10].mxu0 %vm491_vm0, %v1140_v57  ;;  %v1341_v57 = vld [vmem:[%s2770_s4 + $0x50] sm:$0xff] }
 0x31e   : > { %1943 = vmatprep.mubr.msk.f32.mxu0 %vm2227_vm1, %v2226_v7  ;;  %2008 = vmatpush3.bf16.msra.mxu0 %v2007_v41  ;;  %v1535_v41 = vld [vmem:[%s2745_s10 + $0x10] sm:$0xff] }
 0x31f   : > { %2009 = vmatprep.subr.bf16.mxu0 %v2231_v28 }
 0x322   : > { %2011 = vmatpush3.bf16.msra.mxu0 %v2010_v43  ;;  %v2040_v43 = vpack.c.bf16 %v1536_v42, %v1535_v41 }
 0x323   : > { %2012 = vmatprep.subr.bf16.mxu0 %v2231_v28 }
 0x326   : > { %2014 = vmatpush3.bf16.msra.mxu0 %v2013_v46  ;;  %v2043_v46 = vpack.c.bf16 %v1538_v45, %v1537_v44 }
 0x327   : > { %2015 = vmatprep.subr.bf16.mxu0 %v2231_v28 }
 0x32a   : > { %2017 = vmatpush3.bf16.msra.mxu0 %v2016_v51 }
 0x32b   : > { %2018 = vmatprep.subr.bf16.mxu0 %v2231_v28 }
 0x32e   : > { %2020 = vmatpush3.bf16.msra.mxu0 %v2019_v56  ;;  %v1546_v56 = vld [vmem:[%s2745_s10 + $0x68] sm:$0xff] }
 0x32f   : > { %2021 = vmatprep.subr.bf16.mxu0 %v2231_v28 }
 0x3e4   : > { %v2468_v58 = vpop.f32.mrb[4].mxu0 }
 0x3e5   : > { %v1880_v59 = vpop.f32.mrb[5].mxu0 }
 0x3e6   : > { %v1342_v59 = vld [vmem:[%s2770_s4 + $0x58] sm:$0xff] }
 0x3e8   : > { %v878_v60 = vpop.f32.mrb[6].mxu0 }
 0x3e9   : > { %v879_v61 = vadd.f32 %v878_v60, %v2432_v34  ;;  %v1885_v62 = vpop.f32.mrb[7].mxu0  ;;  %v2022_v60 = vpack.c.bf16 %v1342_v59, %v1341_v57  ;;  %v1547_v59 = vld [vmem:[%s2745_s10 + $0x70] sm:$0xff] }
 0x3ea   : > { %v1344_v62 = vld [vmem:[%s2770_s4 + $0x68] sm:$0xff] }
 0x3eb   : > { %v882_v63 = vsel %vm718_vm2, %v879_v61, -inf  ;;  %2023 = vmatpush3.bf16.msra.mxu0 %v2022_v60  ;;  %v1548_v60 = vld [vmem:[%s2745_s10 + $0x78] sm:$0xff] }
 0x3ec   : > { %883 = vmax.xlane.f32.xlu1 %v882_v63  ;;  %v1046_v0 = vpop.f32.mrb[8].mxu0  ;;  %2024 = vmatprep.subr.bf16.mxu0 %v2231_v28 }
 0x3ed   : > { %v1047_v1 = vadd.f32 %v1046_v0, %v2432_v34  ;;  %v1895_v2 = vpop.f32.mrb[9].mxu0  ;;  %v1345_v0 = vld [vmem:[%s2770_s4 + $0x70] sm:$0xff] }
 0x3ef   : > { %v1050_v3 = vsel %vm718_vm2, %v1047_v1, -inf }
 0x3f0   : > { %1051 = vmax.xlane.f32.xlu0 %v1050_v3  ;;  %v1213_v4 = vpop.f32.mrb[10].mxu0 }
 0x3f1   : > { %v1214_v5 = vadd.f32 %v1213_v4, %v2432_v34  ;;  %v1905_v6 = vpop.f32.mrb[11].mxu0 }
 0x3f3   : > { %v1217_v8 = vsel %vm718_vm2, %v1214_v5, -inf }
 0x3f4   : > { %1218 = vmax.xlane.f32.xlu1 %v1217_v8 }
 0x479   : > { %v884_v9 = vpop.xlane.xlu1 %883 }
 0x47a   : > { %v885_v10 = vsub.f32 %v879_v61, %v884_v9  ;;  %v1343_v61 = vld [vmem:[%s2770_s4 + $0x60] sm:$0xff] }
 0x47b   : > { %v2025_v63 = vpack.c.bf16 %v1344_v62, %v1343_v61  ;;  %v2058_v61 = vpack.c.bf16 %v1548_v60, %v1547_v59  ;;  %v1789_v62 = vld [vmem:[%s2744_s9] ss:$0 sm:$0xff] }
 0x47c   : > { %v886_v11 = vmul.f32 1.442695, %v885_v10 }
 0x47d   : > { %v1052_v12 = vpop.xlane.xlu0 %1051  ;;  %2026 = vmatpush3.bf16.msra.mxu0 %v2025_v63 }
 0x47e   : > { %2116 = vpow2.f32 %v886_v11  ;;  %v1053_v14 = vsub.f32 %v1047_v1, %v1052_v12  ;;  %v1346_v1 = vld [vmem:[%s2770_s4 + $0x78] sm:$0xff]  ;;  %2027 = vmatprep.subr.bf16.mxu0 %v2231_v28  ;;  %v1786_v12 = vld [vmem:[%s2740_s5] ss:$0 sm:$0xff] }
 0x47f   : > { %v2028_v2 = vpack.c.bf16 %v1346_v1, %v1345_v0 }
 0x480   : > { %v1054_v15 = vmul.f32 1.442695, %v1053_v14  ;;  %v1330_v14 = vadd.f32 %v1786_v12, %v2387_v13  ;;  %v1449_v13 = vld [vmem:[%s2743_s8 + $0x8] sm:$0xff] }
 0x481   : > { %v1219_v20 = vpop.xlane.xlu1 %1218  ;;  %2029 = vmatpush3.bf16.msra.mxu0 %v2028_v2 }
 0x482   : > { %2118 = vpow2.f32 %v1054_v15  ;;  %v1220_v21 = vsub.f32 %v1214_v5, %v1219_v20 }
 0x484   : > { %v1221_v22 = vmul.f32 1.442695, %v1220_v21 }
 0x486   : > { %2120 = vpow2.f32 %v1221_v22 }
 0x488   : > { %v2117_v16 = vpop.eup %2116 }
 0x489   : > { %v888_v17 = vsel %vm718_vm2, %v2117_v16, 0.0 }
 0x48a   : > { %889 = vadd.xlane.f32.xlu1 %v888_v17 }
 0x48c   : > { %v2119_v18 = vpop.eup %2118 }
 0x48d   : > { %v1056_v19 = vsel %vm718_vm2, %v2119_v18, 0.0 }
 0x48e   : > { %1057 = vadd.xlane.f32.xlu0 %v1056_v19 }
 0x490   : > { %v2121_v23 = vpop.eup %2120 }
 0x491   : > { %v1223_v24 = vsel %vm718_vm2, %v2121_v23, 0.0 }
 0x49b   : > { %1063 = vrot.lane.b32.xlu1 %v2437_v47, %s2768_s15 }
 0x4a4   : > { %896 = vrot.lane.b32.xlu0 %v2437_v47, %s2769_s21 }
 0x4bf   : > { %1224 = vadd.xlane.f32.xlu1 %v1223_v24 }
 0x4d0   : > { %1230 = vrot.lane.b32.xlu1 %v2437_v47, %s2754_s30  ;;  %s1633_s30 = scalar_lea.sflag [#allocation5], %s2443_s23 }
 0x517   : > { %v890_v25 = vpop.xlane.xlu1 %889 }
 0x518   : > { %2122 = vrcp.f32 %v890_v25  ;;  %v1450_v25 = vld [vmem:[%s2743_s8 + $0x10] sm:$0xff] }
 0x51b   : > { %v1058_v26 = vpop.xlane.xlu0 %1057  ;;  %v1064_v31 = vpop.permute.xlu1 %1063 }
 0x51c   : > { %2124 = vrcp.f32 %v1058_v26  ;;  %v1451_v26 = vld [vmem:[%s2743_s8 + $0x18] sm:$0xff] }
 0x51f   : > { %v897_v27 = vpop.permute.xlu0 %896 }
 0x520   : > { %1887 = vmatpush3.msra.mxu1 %v897_v27  ;;  %v2034_v27 = vpack.c.bf16 %v1451_v26, %v1450_v25 }
 0x521   : > { %1896 = vmatprep.subr.mxu1 %v2226_v7 }
 0x522   : > { %v2123_v29 = vpop.eup %2122 }
 0x523   : > { %v892_v30 = vmul.f32 %v2123_v29, %v2117_v16 }
 0x525   : > { %1889 = vmatmul.mubr.msk.f32.vlgmr.msra.gmra.mrb[2].mxu1 %vm718_vm2, %v892_v30  ;;  %1776 = vst.msk [vmem:[%s2447_s20 + $0x8] sm:$0xff] %vm718_vm2, %v892_v30 }
 0x526   : > { %v2125_v32 = vpop.eup %2124  ;;  %1897 = vmatpush3.msra.mxu1 %v1064_v31  ;;  %1898 = vmatprep.mubr.msk.f32.mxu1 %vm2227_vm1, %v2226_v7 }
 0x527   : > { %v1060_v33 = vmul.f32 %v2125_v32, %v2119_v18  ;;  %1906 = vmatprep.subr.mxu1 %v2226_v7 }
 0x529   : > { %1899 = vmatmul.mubr.msk.f32.vlgmr.msra.gmra.mrb[4].mxu1 %vm718_vm2, %v1060_v33  ;;  %1780 = vst.msk [vmem:[%s2447_s20 + $0x10] sm:$0xff] %vm718_vm2, %v1060_v33  ;;  %v1787_v33 = vld [vmem:[%s2741_s6] ss:$0 sm:$0xff] }
 0x52a   : > { %1908 = vmatprep.mubr.msk.f32.mxu1 %vm2227_vm1, %v2226_v7 }
 0x54c   : > { %v1225_v34 = vpop.xlane.xlu1 %1224 }
 0x54d   : > { %2126 = vrcp.f32 %v1225_v34 }
 0x550   : > { %v1231_v35 = vpop.permute.xlu1 %1230 }
 0x551   : > { %1907 = vmatpush3.msra.mxu1 %v1231_v35  ;;  %v1533_v35 = vld [vmem:[%s2745_s10] sm:$0xff] }
 0x552   : > { %2030 = vmatprep.subr.bf16.mxu1 %v2231_v28 }
 0x557   : > { %v2127_v36 = vpop.eup %2126 }
 0x558   : > { %v1227_v37 = vmul.f32 %v2127_v36, %v2121_v23  ;;  %v1448_v23 = vld [vmem:[%s2743_s8] sm:$0xff]  ;;  %v1534_v36 = vld [vmem:[%s2745_s10 + $0x8] sm:$0xff] }
 0x559   : > { %v2031_v24 = vpack.c.bf16 %v1449_v13, %v1448_v23  ;;  %v2037_v39 = vpack.c.bf16 %v1534_v36, %v1533_v35 }
 0x55a   : > { %1909 = vmatmul.mubr.msk.f32.vlgmr.msra.gmra.mrb[6].mxu1 %vm718_vm2, %v1227_v37  ;;  %1784 = vst.msk [vmem:[%s2447_s20 + $0x18] sm:$0xff] %vm718_vm2, %v1227_v37  ;;  %v1788_v37 = vld [vmem:[%s2742_s7] ss:$0 sm:$0xff]  ;;  %s2136_s20 = scalar_lea.vmem %s2135_s16, 1024 }
 0x55b   : > { %1954 = vmatprep.mubr.msk.f32.mxu1 %vm2227_vm1, %v2226_v7  ;;  %2032 = vmatpush3.bf16.msra.mxu1 %v2031_v24  ;;  %p2138_p1 = scmp.lt.s32.totalorder %s2136_s20, %s2130_s0 }
 0x55c   : > { %2033 = vmatprep.subr.bf16.mxu1 %v2231_v28 }
 0x55d   : > { %p2139_p2 = por %p2138_p1, %p2137_p0 }
 0x55f   : > { %2035 = vmatpush3.bf16.msra.mxu1 %v2034_v27  ;;  %p2140_p3 = pnand %p2139_p2, %p2133_p13 }
 0x560   : > { %2036 = vmatprep.subr.bf16.mxu1 %v2231_v28 }
 0x5f8   : > { %v968_v47 = vpop.f32.mrb[2].mxu1 }
 0x5f9   : > { %1307 = vrot.lane.b32.xlu0 %v968_v47, %s2771_s24  ;;  %v1890_v50 = vpop.f32.mrb[3].mxu1  ;;  %v1539_v47 = vld [vmem:[%s2745_s10 + $0x30] sm:$0xff] }
 0x5fa   : > { %v1542_v50 = vld [vmem:[%s2745_s10 + $0x48] sm:$0xff] }
 0x5fb   : > { %v2049_v51 = vpack.c.bf16 %v1542_v50, %v1541_v49 }
 0x5fc   : > { %v1135_v52 = vpop.f32.mrb[4].mxu1 }
 0x5fd   : > { %1311 = vrot.lane.b32.xlu1 %v1135_v52, %s2768_s15  ;;  %v1900_v55 = vpop.f32.mrb[5].mxu1  ;;  %v1543_v52 = vld [vmem:[%s2745_s10 + $0x50] sm:$0xff]  ;;  %s1799_s15 = sshll.u32 %s2327_s29, 9 }
 0x5fe   : > { %v2052_v54 = vpack.c.bf16 %v1544_v53, %v1543_v52  ;;  %v1545_v55 = vld [vmem:[%s2745_s10 + $0x60] sm:$0xff]  ;;  %s2657_s17 = scalar_lea.hbm %s2748_s13, %s1799_s15 }
 0x5ff   : > { %v2055_v57 = vpack.c.bf16 %v1546_v56, %v1545_v55 }
 0x62d   : > { %v1302_v3 = vpop.f32.mrb[6].mxu1 }
 0x62e   : > { %1315 = vrot.lane.b32.xlu0 %v1302_v3, %s2769_s21  ;;  %v1910_v4 = vpop.f32.mrb[7].mxu1 }
 0x66b   : > { %v1308_v5 = vpop.permute.xlu0 %1307 }
 0x66c   : > { %v1318_v8 = vsel %vm491_vm0, %v2468_v58, %v1308_v5 }
 0x66f   : > { %v1312_v6 = vpop.permute.xlu1 %1311 }
 0x670   : > { %v1320_v9 = vsel %vm1319_vm3, %v1318_v8, %v1312_v6 }
 0x6a0   : > { %v1316_v10 = vpop.permute.xlu0 %1315 }
 0x6a1   : > { %v1322_v11 = vsel %vm1321_vm4, %v1320_v9, %v1316_v10 }
 0x6a2   : > { %1944 = vmatmul.mubr.f32.vlgmr.msra.gmra.mrb[12].mxu0 %v1322_v11 }
 0x775   : > { %v1413_v15 = vpop.f32.mrb[12].mxu0 }
 0x776   : > { %v1417_v16 = vadd.f32 %v1413_v15, %v1330_v14  ;;  %v1945_v17 = vpop.f32.mrb[13].mxu0 }
 0x778   : > { %v1418_v18 = vsel %vm491_vm0, %v1417_v16, 0.0 }
 0x779   : > { %1419 = vadd.xlane.f32.xlu1 %v1418_v18 }
 0x806   : > { %v1420_v19 = vpop.xlane.xlu1 %1419 }
 0x807   : > { %v1422_v20 = vmul.f32 0.03125, %v1420_v19 }
 0x809   : > { %v1423_v21 = vsub.f32 %v1417_v16, %v1422_v20 }
 0x80b   : > { %v1424_v58 = vmul.f32 %v1423_v21, %v1423_v21 }
 0x80d   : > { %v1425_v22 = vsel %vm491_vm0, %v1424_v58, 0.0 }
 0x80e   : > { %1426 = vadd.xlane.f32.xlu0 %v1425_v22 }
 0x89b   : > { %v1427_v29 = vpop.xlane.xlu0 %1426 }
 0x89c   : > { %v1428_v30 = vmul.f32 0.03125, %v1427_v29 }
 0x89e   : > { %v1429_v31 = vadd.f32 1e-05, %v1428_v30 }
 0x8a0   : > { %2128 = vrsqrt.f32 %v1429_v31 }
 0x8aa   : > { %v2129_v32 = vpop.eup %2128 }
 0x8ab   : > { %v1431_v34 = vmul.f32 %v2129_v32, %v1423_v21 }
 0x8ad   : > { %v1439_v38 = vmul.f32 %v1787_v33, %v1431_v34 }
 0x8af   : > { %v1447_v40 = vadd.f32 %v1788_v37, %v1439_v38 }
 0x8b1   : > { %1955 = vmatmul.mubr.msk.f32.vlgmr.msra.gmra.mrb[8].mxu1 %vm491_vm0, %v1447_v40 }
 0x8b2   : > { %2038 = vmatpush3.bf16.msra.mxu1 %v2037_v39  ;;  %1989 = vmatprep.mubr.msk.f32.mxu1 %vm2227_vm1, %v2226_v7  ;;  %v1540_v7 = vld [vmem:[%s2745_s10 + $0x38] sm:$0xff] }
 0x8b3   : > { %2039 = vmatprep.subr.bf16.mxu1 %v2231_v28  ;;  %v2046_v48 = vpack.c.bf16 %v1540_v7, %v1539_v47 }
 0x8b6   : > { %2041 = vmatpush3.bf16.msra.mxu1 %v2040_v43 }
 0x8b7   : > { %2042 = vmatprep.subr.bf16.mxu1 %v2231_v28 }
 0x8ba   : > { %2044 = vmatpush3.bf16.msra.mxu1 %v2043_v46 }
 0x8bb   : > { %2045 = vmatprep.subr.bf16.mxu1 %v2231_v28 }
 0x8be   : > { %2047 = vmatpush3.bf16.msra.mxu1 %v2046_v48 }
 0x8bf   : > { %2048 = vmatprep.subr.bf16.mxu1 %v2231_v28 }
 0x8c2   : > { %2050 = vmatpush3.bf16.msra.mxu1 %v2049_v51 }
 0x8c3   : > { %2051 = vmatprep.subr.bf16.mxu1 %v2231_v28 }
 0x8c6   : > { %2053 = vmatpush3.bf16.msra.mxu1 %v2052_v54 }
 0x8c7   : > { %2054 = vmatprep.subr.bf16.mxu1 %v2231_v28 }
 0x8ca   : > { %2056 = vmatpush3.bf16.msra.mxu1 %v2055_v57 }
 0x8cb   : > { %2057 = vmatprep.subr.bf16.mxu1 %v2231_v28 }
 0x8ce   : > { %2059 = vmatpush3.bf16.msra.mxu1 %v2058_v61 }
 0x984   : > { %v1528_v63 = vpop.f32.mrb[8].mxu1 }
 0x985   : > { %v1529_v0 = vadd.f32 %v1789_v62, %v1528_v63  ;;  %v1956_v1 = vpop.f32.mrb[9].mxu1 }
 0x987   : > { %v1532_v2 = vmax.f32 %v1529_v0, 0.0 }
 0x989   : > { %1990 = vmatmul.mubr.f32.vlgmr.msra.gmra.mrb[10].mxu1 %v1532_v2 }
 0x98a   : > { %2143 = shalt.err (!%p2140_p3)
}
 0x98b   : > { %s2144_s21 = scalar_lea.hbm %s2657_s17, 512  ;;  %s2148_s22 = scalar_lea.hbm %s2748_s13, 1024 }
 0x98c   : > { %p2145_p4 = scmp.ne.s32.totalorder %s2657_s17, %s2144_s21  ;;  %p2149_p9 = scmp.lt.u32.totalorder %s2657_s17, %s2748_s13 }
 0x98d   : > { %p2150_p10 = scmp.lt.u32.totalorder %s2148_s22, %s2144_s21  ;;  %p2152_p12 = scmp.lt.u32.totalorder %s2144_s21, %s2657_s17 }
 0x98e   : > { %p2146_p7 = pnand %p2145_p4, %p2344_p5 }
 0x98f   : > { %p2151_p11 = por %p2150_p10, %p2149_p9 }
 0x990   : > { %p2147_p8 = pneg %p2146_p7 }
 0x991   : > { %p2153_p13 = por %p2152_p12, %p2151_p11 }
 0x993   : > { %p2154_p0 = pnand %p2153_p13, %p2147_p8 }
 0x995   : > { %2157 = shalt.err (!%p2154_p0)
}
 0x996   : > { %s2233_s0 = smov 128   ;;  %s2234_s16 = smov 8   ;;  %v1791_v28 = vld [vmem:[%s2746_s11] ss:$0 sm:$0xff] }
 0x997   : > { %2061 = dma.vmem_to_hbm [thread:$0]  (%p2344_p5), %s2652_s2, 512, %s2657_s17, %s1633_s30, %s2233_s0, %s2233_s0, %s2234_s16  }
 0x998   : > { %s1766_s20 = sshll.u32 %s2443_s23, 3  ;;  %s1794_s21 = sshll.u32 %s2327_s29, 7 }
 0x999   : > { %s446_s22 = scalar_lea.vmem [#allocation2], %s1766_s20  ;;  %s2691_s4 = scalar_lea.hbm %s2747_s12, %s1794_s21 }
 0x99a   : > { %s1646_s27 = sshll.u32 %s446_s22, 4  ;;  %s1628_s2 = scalar_lea.sflag [#allocation3], %s2443_s23  ;;  %s2693_s27 = int_to_ptr.vmem [resolvable:$true] %s1646_s27 }
 0x99b   : > { %s2158_s17 = scalar_lea.vmem %s2693_s27, 128  ;;  %s2235_s29 = smov [#allocation2]  }
 0x99c   : > { %p2159_p1 = scmp.ne.s32.totalorder %s2693_s27, %s2158_s17  ;;  %s2162_s30 = sshll.u32 %s2235_s29, 4  ;;  %s2163_s30 = int_to_ptr.vmem [resolvable:$false] %s2162_s30 }
 0x99d   : > { %s2164_s0 = scalar_lea.vmem %s2163_s30, 256  ;;  %p2165_p4 = scmp.lt.s32.totalorder %s2693_s27, %s2163_s30 }
 0x99e   : > { %p2160_p2 = pnand %p2159_p1, %p2344_p5  ;;  %p2166_p7 = scmp.lt.s32.totalorder %s2164_s0, %s2158_s17 }
 0x9a0   : > { %p2161_p3 = pneg %p2160_p2  ;;  %p2167_p8 = por %p2166_p7, %p2165_p4 }
 0x9a2   : > { %p2168_p9 = pnand %p2167_p8, %p2161_p3 }
 0xa5c   : > { %v1622_v3 = vpop.f32.mrb[10].mxu1 }
 0xa5d   : > { %v1623_v4 = vadd.f32 %v1791_v28, %v1622_v3  ;;  %v1991_v5 = vpop.f32.mrb[11].mxu1 }
 0xa5f   : > { %1626 = vst.msk [vmem:[%s446_s22] sm:$0xff] %vm491_vm0, %v1623_v4 }
 0xa60   : > { %2171 = shalt.err (!%p2168_p9)
}
 0xa61   : > { %s2172_s3 = scalar_lea.hbm %s2691_s4, 128  ;;  %s2176_s20 = scalar_lea.hbm %s2747_s12, 256 }
 0xa62   : > { %p2173_p10 = scmp.ne.s32.totalorder %s2691_s4, %s2172_s3  ;;  %p2177_p13 = scmp.lt.u32.totalorder %s2691_s4, %s2747_s12 }
 0xa63   : > { %p2178_p0 = scmp.lt.u32.totalorder %s2176_s20, %s2172_s3  ;;  %p2180_p2 = scmp.lt.u32.totalorder %s2172_s3, %s2691_s4 }
 0xa64   : > { %p2174_p11 = pnand %p2173_p10, %p2344_p5 }
 0xa65   : > { %p2179_p1 = por %p2178_p0, %p2177_p13 }
 0xa66   : > { %p2175_p12 = pneg %p2174_p11 }
 0xa67   : > { %p2181_p3 = por %p2180_p2, %p2179_p1 }
 0xa69   : > { %p2182_p4 = pnand %p2181_p3, %p2175_p12 }
 0xa6b   : > { %2185 = shalt.err (!%p2182_p4)
}
 0xa6c   : > { %2060 = dma.vmem_to_hbm [thread:$0]  (%p2344_p5), %s2693_s27, 128, %s2691_s4, %s1628_s2  }
 0xa6d PF: > { %p2071_p7 = scmp.ge.s32.totalorder %s2224_s28, 2  ;;  %s1674_s21 = sand.u32 1, %s2212_s25  }
 0xa6e   : > { %s1675_s22 = scalar_lea.sflag [#allocation3], %s1674_s21 }
 0xa6f   : > { %p2065_p8 = pnand %p2071_p7, %p2348_p6 }
 0xa71   : > { %2203 = dma.done.wait (!%p2065_p8), %s1675_s22, 128  }
 0xa72   : > { %2205 = vsyncadd (!%p2065_p8), %s1675_s22, 4294967168  ;;  %s1684_s1 = scalar_lea.sflag [#allocation5], %s1674_s21 }
 0xa73   : > { %2207 = dma.done.wait (!%p2065_p8), %s1684_s1, 512  }
 0xa74   : > { %2209 = vsyncadd (!%p2065_p8), %s1684_s1, 4294966784  ;;  %s2772_s18 = sld [smem:[#allocation8_spill]]  ;;  %s2773_s27 = sld [smem:[#allocation9_spill]] }
 0xa75   : > { %p27_p5 = scmp.ge.s32.totalorder %s2331_s14, 4   ;;  %s2774_s25 = smov %s2216_s26 }
 0xa76   : > { %s2776_s28 = smov %s2331_s14 }
 0xa77   :  { %29 = sbr.rel (!%p27_p5) target bundleno = 11 (0xb), region = 126 }
 0xa7a   : > { %s2775_s26 = smov %s2772_s18 }
 0xa7e   :  { %1689 = vsyncpa [#allocation3], 1 }
 0xa7f   :  { %1691 = vsyncpa [#allocation3 + $0x1], 1 }
 0xa80   :  { %1692 = vsyncpa [#allocation5], 1 }
 0xa81   :  { %1694 = vsyncpa [#allocation5 + $0x1], 1 }

</bundles_post_ra>
